<compile_context>
chip_gen: v7x
topology: tpu7x:2x2x1
jax: 0.10.0
libtpu: 0.0.40
codegen_flags: <defaults>
</compile_context>

<pallas_src>
import numpy as np
import jax
import jax.numpy as jnp
from jax import lax
from jax.experimental import pallas as pl
from jax.experimental.pallas import tpu as pltpu


_MXU_MIN_CHANNELS = 16          # fused-weight MXU path crossover
_SMALL_FOLD_MAX_BYTES = 8 << 20  # fold the whole batch into one step below this


def _tap_table(H, W, K, pad):
    """Static per-tap metadata: (tap index, lane shift, mask row or None)."""
    HW = H * W
    taps = []
    mrow = 0
    for kh in range(K):
        for kw in range(K):
            dh, dc = kh - pad, kw - pad
            shift = (-(dh * W + dc)) % HW
            if dh == 0 and dc == 0:
                taps.append((kh * K + kw, shift, None))   # center: no mask
            else:
                taps.append((kh * K + kw, shift, mrow))
                mrow += 1
    return taps


def _boundary_masks(H, W, K, pad, dtype):
    """0/1 mask per non-center tap: zero where the tap reads outside the image."""
    rows = []
    for kh in range(K):
        for kw in range(K):
            dh, dc = kh - pad, kw - pad
            if dh == 0 and dc == 0:
                continue
            m = np.zeros((H, W), np.float32)
            i0, i1 = max(0, -dh), min(H, H - dh)
            j0, j1 = max(0, -dc), min(W, W - dc)
            m[i0:i1, j0:j1] = 1.0
            rows.append(m.reshape(-1))
    return jnp.asarray(np.stack(rows), dtype=dtype)


def _vmem_limit_bytes(per_step_bytes):
    """Generation-aware scoped-VMEM limit (v7x: 64 MiB/TC; v5e/v6e: 128 MiB)."""
    phys = 128 << 20
    try:
        info_fn = getattr(pltpu, "get_tpu_info", None)
        if info_fn is not None:
            phys = int(getattr(info_fn(), "vmem_capacity_bytes", phys))
    except Exception:
        pass
    budget = int(phys * 0.75)                 # leave headroom for Mosaic scratch
    want = int(per_step_bytes) + (8 << 20)
    return max(32 << 20, min(want, budget))


def _make_fused_mxu_kernel(C, Cout, H, W, K, pad, mxu_dtype):
    """Depthwise folded into 9 per-tap (Cout, C) @ (C, HW) MXU dots, f32 acc."""
    HW = H * W
    taps = _tap_table(H, W, K, pad)

    def kernel(x_ref, m_ref, wf_ref, o_ref):
        # x_ref : (C, HW)          flattened input image (lane-dense)
        # m_ref : (K*K-1, HW)      0/1 boundary masks (non-center taps)
        # wf_ref: (K*K, Cout, C)   fused per-tap weights  pw[o,c] * dw[c,t]
        # o_ref : (Cout, HW)       flattened output (lane-dense)
        x = x_ref[...].astype(mxu_dtype)          # no-op for bf16 inputs
        acc = jnp.zeros((Cout, HW), jnp.float32)
        for t, shift, mrow in taps:
            xs = x if shift == 0 else pltpu.roll(x, shift, axis=1)
            if mrow is not None:
                xs = xs * m_ref[mrow:mrow + 1, :]            # (1, HW) broadcast
            acc = acc + jnp.dot(wf_ref[t], xs,               # MXU, f32 accum
                                preferred_element_type=jnp.float32)
        o_ref[...] = acc.astype(o_ref.dtype)                 # one lane-dense store

    return kernel


def _make_small_vpu_kernel(B, C, Cout, H, W, K, pad):
    """Tiny channels: batch folded onto sublanes, exact f32 VPU arithmetic."""
    HW = H * W
    taps = _tap_table(H, W, K, pad)

    def kernel(x_ref, m_ref, dw_ref, pw_ref, o_ref):
        # x_ref : (B*C, HW)        all images' channels folded onto sublanes
        # m_ref : (K*K-1, HW)      0/1 boundary masks (f32)
        # dw_ref: (B*C, K*K)       depthwise weights tiled per image
        # pw_ref: (Cout, C)        pointwise weights
        # o_ref : (B*Cout, HW)
        x = x_ref[...].astype(jnp.float32)     # f32 accumulation (v5e: no bf16 VALU)
        dw = dw_ref[...].astype(jnp.float32)
        m = m_ref[...]

        acc = jnp.zeros((B * C, HW), jnp.float32)
        for t, shift, mrow in taps:
            xs = x if shift == 0 else pltpu.roll(x, shift, axis=1)
            term = xs * dw[:, t:t + 1]
            if mrow is not None:
                term = term * m[mrow:mrow + 1, :]
            acc = acc + term

        pw = pw_ref[...].astype(jnp.float32)   # (Cout, C)
        for b in range(B):                     # per-image 1x1 conv via VPU MACs
            ob = jnp.zeros((Cout, HW), jnp.float32)
            for c in range(C):
                ob = ob + acc[b * C + c:b * C + c + 1, :] * pw[:, c:c + 1]
            o_ref[b * Cout:(b + 1) * Cout, :] = ob.astype(o_ref.dtype)

    return kernel


def separable_conv2d(x, dw_weight, pw_weight, *, allow_bf16_matmul=False):
    """x: (B, C, H, W); dw_weight: (C, 1, K, K); pw_weight: (Cout, C, 1, 1)."""
    B, C, H, W = x.shape
    K = dw_weight.shape[-1]
    Cout = pw_weight.shape[0]
    pad = 1  # the PyTorch module hardcodes padding=1
    # In-kernel halo handling (roll + boundary mask) assumes a 'same' conv.
    assert K == 2 * pad + 1, "kernel assumes padding=1 'same' conv (K == 3)"
    HW = H * W

    dw = dw_weight.reshape(C, K * K)
    pw = pw_weight.reshape(Cout, C)

    # Rough f32 working set if the whole batch is folded into one grid step.
    folded_bytes = (B * (3 * C + 2 * Cout) + K * K) * HW * 4
    use_small = (min(C, Cout) < _MXU_MIN_CHANNELS
                 and folded_bytes <= _SMALL_FOLD_MAX_BYTES)

    if not use_small:
        # ---- fused-weight MXU path (production channel counts) ----
        if x.dtype == jnp.bfloat16 or allow_bf16_matmul:
            mxu_dtype = jnp.bfloat16
        else:
            mxu_dtype = x.dtype
        bpe_x = jnp.dtype(x.dtype).itemsize
        bpe_m = jnp.dtype(mxu_dtype).itemsize

        x_flat = x.reshape(B, C, HW)                 # contiguous reshape: free
        masks = _boundary_masks(H, W, K, pad, mxu_dtype)
        # Fused per-tap weights: Wf[t, o, c] = pw[o, c] * dw[c, t].
        wf = (pw.astype(jnp.float32)[None, :, :]
              * dw.astype(jnp.float32).T[:, None, :]).astype(mxu_dtype)

        per_step = (2 * C * HW * bpe_x + 2 * Cout * HW * bpe_x
                    + (K * K - 1) * HW * bpe_m + K * K * Cout * C * bpe_m
                    + Cout * HW * 4 + 2 * C * HW * bpe_m)

        kernel = _make_fused_mxu_kernel(C, Cout, H, W, K, pad, mxu_dtype)
        out_flat = pl.pallas_call(
            kernel,
            out_shape=jax.ShapeDtypeStruct((B, Cout, HW), x.dtype),
            grid_spec=pltpu.PrefetchScalarGridSpec(
                num_scalar_prefetch=0,
                grid=(B,),
                in_specs=[
                    pl.BlockSpec((None, C, HW), lambda b: (b, 0, 0)),
                    pl.BlockSpec((K * K - 1, HW), lambda b: (0, 0)),       # resident
                    pl.BlockSpec((K * K, Cout, C), lambda b: (0, 0, 0)),   # resident
                ],
                out_specs=pl.BlockSpec((None, Cout, HW), lambda b: (b, 0, 0)),
            ),
            compiler_params=pltpu.CompilerParams(
                dimension_semantics=("parallel",),
                vmem_limit_bytes=_vmem_limit_bytes(per_step),
            ),
        )(x_flat, masks, wf)
        return out_flat.reshape(B, Cout, H, W)

    # ---- tiny-channel VPU path (batch folded, single grid step) ----
    masks = _boundary_masks(H, W, K, pad, jnp.float32)
    x2d = x.reshape(B * C, HW)                       # contiguous reshape: free
    dw_tiled = jnp.tile(dw, (B, 1))                  # (B*C, K*K)

    per_step = (3 * B * C * HW * 4 + 2 * B * Cout * HW * 4
                + (K * K - 1) * HW * 4 + B * C * K * K * 4 + Cout * C * 4)

    kernel = _make_small_vpu_kernel(B, C, Cout, H, W, K, pad)
    out2d = pl.pallas_call(
        kernel,
        out_shape=jax.ShapeDtypeStruct((B * Cout, HW), x.dtype),
        grid_spec=pltpu.PrefetchScalarGridSpec(
            num_scalar_prefetch=0,
            grid=(1,),
            in_specs=[
                pl.BlockSpec((B * C, HW), lambda i: (0, 0)),
                pl.BlockSpec((K * K - 1, HW), lambda i: (0, 0)),
                pl.BlockSpec((B * C, K * K), lambda i: (0, 0)),
                pl.BlockSpec((Cout, C), lambda i: (0, 0)),
            ],
            out_specs=pl.BlockSpec((B * Cout, HW), lambda i: (0, 0)),
        ),
        compiler_params=pltpu.CompilerParams(
            dimension_semantics=("arbitrary",),
            vmem_limit_bytes=_vmem_limit_bytes(per_step),
        ),
    )(x2d, masks, dw_tiled, pw)
    return out2d.reshape(B, Cout, H, W)


def _reference(x, dw_weight, pw_weight):
    C = x.shape[1]
    y = lax.conv_general_dilated(
        x, dw_weight, window_strides=(1, 1), padding=[(1, 1), (1, 1)],
        dimension_numbers=("NCHW", "OIHW", "NCHW"), feature_group_count=C)
    y = lax.conv_general_dilated(
        y, pw_weight, window_strides=(1, 1), padding=[(0, 0), (0, 0)],
        dimension_numbers=("NCHW", "OIHW", "NCHW"))
    return y


if __name__ == "__main__":
    key = jax.random.PRNGKey(0)
    k_x, k_dw, k_pw = jax.random.split(key, 3)

    # --- tiny-channel path (module's test-scale usage), exact f32 ---
    B, C_in, C_out, H, W, K = 2, 4, 8, 16, 16, 3
    x = jax.random.normal(k_x, (B, C_in, H, W), dtype=jnp.float32)
    dw_weight = jax.random.normal(k_dw, (C_in, 1, K, K), dtype=jnp.float32) * 0.1
    pw_weight = jax.random.normal(k_pw, (C_out, C_in, 1, 1), dtype=jnp.float32) * 0.1

    out = separable_conv2d(x, dw_weight, pw_weight)
    out = jax.block_until_ready(out)
    ref = _reference(x, dw_weight, pw_weight)
    assert out.shape == ref.shape
    assert jnp.allclose(out, ref, atol=1e-4, rtol=1e-4)

    # --- fused-weight MXU path (production channel counts, bf16 operands) ---
    B2, C2, Cout2 = 1, 32, 32
    k_x2, k_dw2, k_pw2 = jax.random.split(jax.random.PRNGKey(0), 3)
    x2 = jax.random.normal(k_x2, (B2, C2, H, W), dtype=jnp.float32).astype(jnp.bfloat16)
    dw2 = (jax.random.normal(k_dw2, (C2, 1, K, K), dtype=jnp.float32) * 0.1).astype(jnp.bfloat16)
    pw2 = (jax.random.normal(k_pw2, (Cout2, C2, 1, 1), dtype=jnp.float32) * 0.1).astype(jnp.bfloat16)

    out2 = jax.block_until_ready(separable_conv2d(x2, dw2, pw2))
    ref2 = _reference(x2.astype(jnp.float32), dw2.astype(jnp.float32),
                      pw2.astype(jnp.float32))
    assert out2.shape == ref2.shape
    assert jnp.allclose(out2.astype(jnp.float32), ref2, atol=5e-2, rtol=5e-2)

    print("KERNEL_OK")
</pallas_src>

<mosaic_0001>
module attributes {stable_mosaic.version = 11 : i64} {
  func.func @kernel(%arg0: i32, %arg1: memref<8x256xf32, #tpu.memory_space<vmem>>, %arg2: memref<8x256xf32, #tpu.memory_space<vmem>>, %arg3: memref<8x9xf32, #tpu.memory_space<vmem>>, %arg4: memref<8x4xf32, #tpu.memory_space<vmem>>, %arg5: memref<16x256xf32, #tpu.memory_space<vmem>>) attributes {dimension_semantics = [#tpu.dimension_semantics<arbitrary>], iteration_bounds = array<i64: 1>, scalar_prefetch = 0 : i64, scratch_operands = 0 : i64, tpu.core_type = #tpu.core_type<tc>, window_params = [{pipeline_mode = #tpu.pipeline_mode<synchronous>, transform_indices = @transform_0, window_bounds = array<i64: 8, 256>}, {pipeline_mode = #tpu.pipeline_mode<synchronous>, transform_indices = @transform_1, window_bounds = array<i64: 8, 256>}, {pipeline_mode = #tpu.pipeline_mode<synchronous>, transform_indices = @transform_2, window_bounds = array<i64: 8, 9>}, {pipeline_mode = #tpu.pipeline_mode<synchronous>, transform_indices = @transform_3, window_bounds = array<i64: 8, 4>}, {pipeline_mode = #tpu.pipeline_mode<synchronous>, transform_indices = @transform_4, window_bounds = array<i64: 16, 256>}]} {
    %c0 = arith.constant 0 : index
    %c0_0 = arith.constant 0 : index
    %0 = vector.load %arg1[%c0, %c0_0] : memref<8x256xf32, #tpu.memory_space<vmem>>, vector<8x256xf32>
    %c0_1 = arith.constant 0 : index
    %c0_2 = arith.constant 0 : index
    %1 = vector.load %arg3[%c0_1, %c0_2] : memref<8x9xf32, #tpu.memory_space<vmem>>, vector<8x9xf32>
    %c0_3 = arith.constant 0 : index
    %c0_4 = arith.constant 0 : index
    %2 = vector.load %arg2[%c0_3, %c0_4] : memref<8x256xf32, #tpu.memory_space<vmem>>, vector<8x256xf32>
    %cst = arith.constant 0.000000e+00 : f32
    %3 = vector.broadcast %cst : f32 to vector<8x256xf32>
    %c17_i32 = arith.constant 17 : i32
    %4 = tpu.dynamic_rotate %0 by %c17_i32 dim 1 : vector<8x256xf32>, i32 -> vector<8x256xf32>
    %5 = vector.extract_strided_slice %1 {offsets = [0, 0], sizes = [8, 1], strides = [1, 1]} : vector<8x9xf32> to vector<8x1xf32>
    %6 = vector.broadcast %5 : vector<8x1xf32> to vector<8x256xf32>
    %7 = arith.mulf %4, %6 : vector<8x256xf32>
    %8 = vector.extract_strided_slice %2 {offsets = [0, 0], sizes = [1, 256], strides = [1, 1]} : vector<8x256xf32> to vector<1x256xf32>
    %9 = vector.broadcast %8 : vector<1x256xf32> to vector<8x256xf32>
    %10 = arith.mulf %7, %9 : vector<8x256xf32>
    %11 = arith.addf %3, %10 : vector<8x256xf32>
    %c16_i32 = arith.constant 16 : i32
    %12 = tpu.dynamic_rotate %0 by %c16_i32 dim 1 : vector<8x256xf32>, i32 -> vector<8x256xf32>
    %13 = vector.extract_strided_slice %1 {offsets = [0, 1], sizes = [8, 1], strides = [1, 1]} : vector<8x9xf32> to vector<8x1xf32>
    %14 = vector.broadcast %13 : vector<8x1xf32> to vector<8x256xf32>
    %15 = arith.mulf %12, %14 : vector<8x256xf32>
    %16 = vector.extract_strided_slice %2 {offsets = [1, 0], sizes = [1, 256], strides = [1, 1]} : vector<8x256xf32> to vector<1x256xf32>
    %17 = vector.broadcast %16 : vector<1x256xf32> to vector<8x256xf32>
    %18 = arith.mulf %15, %17 : vector<8x256xf32>
    %19 = arith.addf %11, %18 : vector<8x256xf32>
    %c15_i32 = arith.constant 15 : i32
    %20 = tpu.dynamic_rotate %0 by %c15_i32 dim 1 : vector<8x256xf32>, i32 -> vector<8x256xf32>
    %21 = vector.extract_strided_slice %1 {offsets = [0, 2], sizes = [8, 1], strides = [1, 1]} : vector<8x9xf32> to vector<8x1xf32>
    %22 = vector.broadcast %21 : vector<8x1xf32> to vector<8x256xf32>
    %23 = arith.mulf %20, %22 : vector<8x256xf32>
    %24 = vector.extract_strided_slice %2 {offsets = [2, 0], sizes = [1, 256], strides = [1, 1]} : vector<8x256xf32> to vector<1x256xf32>
    %25 = vector.broadcast %24 : vector<1x256xf32> to vector<8x256xf32>
    %26 = arith.mulf %23, %25 : vector<8x256xf32>
    %27 = arith.addf %19, %26 : vector<8x256xf32>
    %c1_i32 = arith.constant 1 : i32
    %28 = tpu.dynamic_rotate %0 by %c1_i32 dim 1 : vector<8x256xf32>, i32 -> vector<8x256xf32>
    %29 = vector.extract_strided_slice %1 {offsets = [0, 3], sizes = [8, 1], strides = [1, 1]} : vector<8x9xf32> to vector<8x1xf32>
    %30 = vector.broadcast %29 : vector<8x1xf32> to vector<8x256xf32>
    %31 = arith.mulf %28, %30 : vector<8x256xf32>
    %32 = vector.extract_strided_slice %2 {offsets = [3, 0], sizes = [1, 256], strides = [1, 1]} : vector<8x256xf32> to vector<1x256xf32>
    %33 = vector.broadcast %32 : vector<1x256xf32> to vector<8x256xf32>
    %34 = arith.mulf %31, %33 : vector<8x256xf32>
    %35 = arith.addf %27, %34 : vector<8x256xf32>
    %36 = vector.extract_strided_slice %1 {offsets = [0, 4], sizes = [8, 1], strides = [1, 1]} : vector<8x9xf32> to vector<8x1xf32>
    %37 = vector.broadcast %36 : vector<8x1xf32> to vector<8x256xf32>
    %38 = arith.mulf %0, %37 : vector<8x256xf32>
    %39 = arith.addf %35, %38 : vector<8x256xf32>
    %c255_i32 = arith.constant 255 : i32
    %40 = tpu.dynamic_rotate %0 by %c255_i32 dim 1 : vector<8x256xf32>, i32 -> vector<8x256xf32>
    %41 = vector.extract_strided_slice %1 {offsets = [0, 5], sizes = [8, 1], strides = [1, 1]} : vector<8x9xf32> to vector<8x1xf32>
    %42 = vector.broadcast %41 : vector<8x1xf32> to vector<8x256xf32>
    %43 = arith.mulf %40, %42 : vector<8x256xf32>
    %44 = vector.extract_strided_slice %2 {offsets = [4, 0], sizes = [1, 256], strides = [1, 1]} : vector<8x256xf32> to vector<1x256xf32>
    %45 = vector.broadcast %44 : vector<1x256xf32> to vector<8x256xf32>
    %46 = arith.mulf %43, %45 : vector<8x256xf32>
    %47 = arith.addf %39, %46 : vector<8x256xf32>
    %c241_i32 = arith.constant 241 : i32
    %48 = tpu.dynamic_rotate %0 by %c241_i32 dim 1 : vector<8x256xf32>, i32 -> vector<8x256xf32>
    %49 = vector.extract_strided_slice %1 {offsets = [0, 6], sizes = [8, 1], strides = [1, 1]} : vector<8x9xf32> to vector<8x1xf32>
    %50 = vector.broadcast %49 : vector<8x1xf32> to vector<8x256xf32>
    %51 = arith.mulf %48, %50 : vector<8x256xf32>
    %52 = vector.extract_strided_slice %2 {offsets = [5, 0], sizes = [1, 256], strides = [1, 1]} : vector<8x256xf32> to vector<1x256xf32>
    %53 = vector.broadcast %52 : vector<1x256xf32> to vector<8x256xf32>
    %54 = arith.mulf %51, %53 : vector<8x256xf32>
    %55 = arith.addf %47, %54 : vector<8x256xf32>
    %c240_i32 = arith.constant 240 : i32
    %56 = tpu.dynamic_rotate %0 by %c240_i32 dim 1 : vector<8x256xf32>, i32 -> vector<8x256xf32>
    %57 = vector.extract_strided_slice %1 {offsets = [0, 7], sizes = [8, 1], strides = [1, 1]} : vector<8x9xf32> to vector<8x1xf32>
    %58 = vector.broadcast %57 : vector<8x1xf32> to vector<8x256xf32>
    %59 = arith.mulf %56, %58 : vector<8x256xf32>
    %60 = vector.extract_strided_slice %2 {offsets = [6, 0], sizes = [1, 256], strides = [1, 1]} : vector<8x256xf32> to vector<1x256xf32>
    %61 = vector.broadcast %60 : vector<1x256xf32> to vector<8x256xf32>
    %62 = arith.mulf %59, %61 : vector<8x256xf32>
    %63 = arith.addf %55, %62 : vector<8x256xf32>
    %c239_i32 = arith.constant 239 : i32
    %64 = tpu.dynamic_rotate %0 by %c239_i32 dim 1 : vector<8x256xf32>, i32 -> vector<8x256xf32>
    %65 = vector.extract_strided_slice %1 {offsets = [0, 8], sizes = [8, 1], strides = [1, 1]} : vector<8x9xf32> to vector<8x1xf32>
    %66 = vector.broadcast %65 : vector<8x1xf32> to vector<8x256xf32>
    %67 = arith.mulf %64, %66 : vector<8x256xf32>
    %68 = vector.extract_strided_slice %2 {offsets = [7, 0], sizes = [1, 256], strides = [1, 1]} : vector<8x256xf32> to vector<1x256xf32>
    %69 = vector.broadcast %68 : vector<1x256xf32> to vector<8x256xf32>
    %70 = arith.mulf %67, %69 : vector<8x256xf32>
    %71 = arith.addf %63, %70 : vector<8x256xf32>
    %c0_5 = arith.constant 0 : index
    %c0_6 = arith.constant 0 : index
    %72 = vector.load %arg4[%c0_5, %c0_6] : memref<8x4xf32, #tpu.memory_space<vmem>>, vector<8x4xf32>
    %cst_7 = arith.constant 0.000000e+00 : f32
    %73 = vector.broadcast %cst_7 : f32 to vector<8x256xf32>
    %74 = vector.extract_strided_slice %71 {offsets = [0, 0], sizes = [1, 256], strides = [1, 1]} : vector<8x256xf32> to vector<1x256xf32>
    %75 = vector.extract_strided_slice %72 {offsets = [0, 0], sizes = [8, 1], strides = [1, 1]} : vector<8x4xf32> to vector<8x1xf32>
    %76 = vector.broadcast %74 : vector<1x256xf32> to vector<8x256xf32>
    %77 = vector.broadcast %75 : vector<8x1xf32> to vector<8x256xf32>
    %78 = arith.mulf %76, %77 : vector<8x256xf32>
    %79 = arith.addf %73, %78 : vector<8x256xf32>
    %80 = vector.extract_strided_slice %71 {offsets = [1, 0], sizes = [1, 256], strides = [1, 1]} : vector<8x256xf32> to vector<1x256xf32>
    %81 = vector.extract_strided_slice %72 {offsets = [0, 1], sizes = [8, 1], strides = [1, 1]} : vector<8x4xf32> to vector<8x1xf32>
    %82 = vector.broadcast %80 : vector<1x256xf32> to vector<8x256xf32>
    %83 = vector.broadcast %81 : vector<8x1xf32> to vector<8x256xf32>
    %84 = arith.mulf %82, %83 : vector<8x256xf32>
    %85 = arith.addf %79, %84 : vector<8x256xf32>
    %86 = vector.extract_strided_slice %71 {offsets = [2, 0], sizes = [1, 256], strides = [1, 1]} : vector<8x256xf32> to vector<1x256xf32>
    %87 = vector.extract_strided_slice %72 {offsets = [0, 2], sizes = [8, 1], strides = [1, 1]} : vector<8x4xf32> to vector<8x1xf32>
    %88 = vector.broadcast %86 : vector<1x256xf32> to vector<8x256xf32>
    %89 = vector.broadcast %87 : vector<8x1xf32> to vector<8x256xf32>
    %90 = arith.mulf %88, %89 : vector<8x256xf32>
    %91 = arith.addf %85, %90 : vector<8x256xf32>
    %92 = vector.extract_strided_slice %71 {offsets = [3, 0], sizes = [1, 256], strides = [1, 1]} : vector<8x256xf32> to vector<1x256xf32>
    %93 = vector.extract_strided_slice %72 {offsets = [0, 3], sizes = [8, 1], strides = [1, 1]} : vector<8x4xf32> to vector<8x1xf32>
    %94 = vector.broadcast %92 : vector<1x256xf32> to vector<8x256xf32>
    %95 = vector.broadcast %93 : vector<8x1xf32> to vector<8x256xf32>
    %96 = arith.mulf %94, %95 : vector<8x256xf32>
    %97 = arith.addf %91, %96 : vector<8x256xf32>
    %c0_8 = arith.constant 0 : index
    %c0_9 = arith.constant 0 : index
    %98 = vector.load %arg5[%c0_8, %c0_9] : memref<16x256xf32, #tpu.memory_space<vmem>>, vector<8x256xf32>
    tpu.vector_store %arg5[%c0_8, %c0_9], %97 {strides = array<i32>} : memref<16x256xf32, #tpu.memory_space<vmem>>, vector<8x256xf32>,
    %cst_10 = arith.constant 0.000000e+00 : f32
    %99 = vector.broadcast %cst_10 : f32 to vector<8x256xf32>
    %100 = vector.extract_strided_slice %71 {offsets = [4, 0], sizes = [1, 256], strides = [1, 1]} : vector<8x256xf32> to vector<1x256xf32>
    %101 = vector.extract_strided_slice %72 {offsets = [0, 0], sizes = [8, 1], strides = [1, 1]} : vector<8x4xf32> to vector<8x1xf32>
    %102 = vector.broadcast %100 : vector<1x256xf32> to vector<8x256xf32>
    %103 = vector.broadcast %101 : vector<8x1xf32> to vector<8x256xf32>
    %104 = arith.mulf %102, %103 : vector<8x256xf32>
    %105 = arith.addf %99, %104 : vector<8x256xf32>
    %106 = vector.extract_strided_slice %71 {offsets = [5, 0], sizes = [1, 256], strides = [1, 1]} : vector<8x256xf32> to vector<1x256xf32>
    %107 = vector.extract_strided_slice %72 {offsets = [0, 1], sizes = [8, 1], strides = [1, 1]} : vector<8x4xf32> to vector<8x1xf32>
    %108 = vector.broadcast %106 : vector<1x256xf32> to vector<8x256xf32>
    %109 = vector.broadcast %107 : vector<8x1xf32> to vector<8x256xf32>
    %110 = arith.mulf %108, %109 : vector<8x256xf32>
    %111 = arith.addf %105, %110 : vector<8x256xf32>
    %112 = vector.extract_strided_slice %71 {offsets = [6, 0], sizes = [1, 256], strides = [1, 1]} : vector<8x256xf32> to vector<1x256xf32>
    %113 = vector.extract_strided_slice %72 {offsets = [0, 2], sizes = [8, 1], strides = [1, 1]} : vector<8x4xf32> to vector<8x1xf32>
    %114 = vector.broadcast %112 : vector<1x256xf32> to vector<8x256xf32>
    %115 = vector.broadcast %113 : vector<8x1xf32> to vector<8x256xf32>
    %116 = arith.mulf %114, %115 : vector<8x256xf32>
    %117 = arith.addf %111, %116 : vector<8x256xf32>
    %118 = vector.extract_strided_slice %71 {offsets = [7, 0], sizes = [1, 256], strides = [1, 1]} : vector<8x256xf32> to vector<1x256xf32>
    %119 = vector.extract_strided_slice %72 {offsets = [0, 3], sizes = [8, 1], strides = [1, 1]} : vector<8x4xf32> to vector<8x1xf32>
    %120 = vector.broadcast %118 : vector<1x256xf32> to vector<8x256xf32>
    %121 = vector.broadcast %119 : vector<8x1xf32> to vector<8x256xf32>
    %122 = arith.mulf %120, %121 : vector<8x256xf32>
    %123 = arith.addf %117, %122 : vector<8x256xf32>
    %c8 = arith.constant 8 : index
    %c0_11 = arith.constant 0 : index
    %124 = vector.load %arg5[%c8, %c0_11] : memref<16x256xf32, #tpu.memory_space<vmem>>, vector<8x256xf32>
    tpu.vector_store %arg5[%c8, %c0_11], %123 {strides = array<i32>} : memref<16x256xf32, #tpu.memory_space<vmem>>, vector<8x256xf32>,
    return
  }
  func.func @transform_0(%arg0: i32) -> (i32, i32) {
    %c0_i32 = arith.constant 0 : i32
    %c0_i32_0 = arith.constant 0 : i32
    %c0_i32_1 = arith.constant 0 : i32
    return %c0_i32, %c0_i32_0 : i32, i32
  }
  func.func @transform_1(%arg0: i32) -> (i32, i32) {
    %c0_i32 = arith.constant 0 : i32
    %c0_i32_0 = arith.constant 0 : i32
    %c0_i32_1 = arith.constant 0 : i32
    return %c0_i32, %c0_i32_0 : i32, i32
  }
  func.func @transform_2(%arg0: i32) -> (i32, i32) {
    %c0_i32 = arith.constant 0 : i32
    %c0_i32_0 = arith.constant 0 : i32
    %c0_i32_1 = arith.constant 0 : i32
    return %c0_i32, %c0_i32_0 : i32, i32
  }
  func.func @transform_3(%arg0: i32) -> (i32, i32) {
    %c0_i32 = arith.constant 0 : i32
    %c0_i32_0 = arith.constant 0 : i32
    %c0_i32_1 = arith.constant 0 : i32
    return %c0_i32, %c0_i32_0 : i32, i32
  }
  func.func @transform_4(%arg0: i32) -> (i32, i32) {
    %c0_i32 = arith.constant 0 : i32
    %c0_i32_0 = arith.constant 0 : i32
    %c0_i32_1 = arith.constant 0 : i32
    return %c0_i32, %c0_i32_0 : i32, i32
  }
}

</mosaic_0001>

<bundles_post_ra>
// kernel: tpu_custom_call.1
= control target key start
LH: loop header
LB: loop body
LE: loop exit
PB: predicated region body
PF: predicated region fallthrough
CT: control target
= control target key end

     0   :  { %9 = vsyncpa [#allocation3], 0  ;;  %s720_s0 = inlined_call_operand.hbm [shape: f32[8,256], index: 0, kind: input, shape index: {}]   ;;  %s721_s1 = inlined_call_operand.hbm [shape: f32[8,256], index: 1, kind: input, shape index: {}]   ;;  %s722_s2 = inlined_call_operand.vmem [shape: f32[8,9], index: 2, kind: input, shape index: {}]   ;;  %s723_s3 = inlined_call_operand.vmem [shape: f32[8,4], index: 3, kind: input, shape index: {}]   ;;  %s724_s4 = inlined_call_operand.hbm [shape: f32[16,256], index: 4, kind: output, shape index: {}]  }
   0x1   :  { %10 = vsyncpa [#allocation6], 0 }
   0x2   :  { %11 = vsyncpa [#allocation4], 0  ;;  %s499_s15 = smov [#allocation2]   ;;  %s500_s17 = smov [#allocation5]  }
   0x3   :  { %s18_s16 = sshll.u32 %s499_s15, 4  ;;  %s28_s18 = sshll.u32 %s500_s17, 4  ;;  %s19_s16 = int_to_ptr.vmem [resolvable:$true] %s18_s16  ;;  %s29_s18 = int_to_ptr.vmem [resolvable:$true] %s28_s18 }
   0x4   :  { %s427_s21 = scalar_lea.hbm %s720_s0, 256 }
   0x5   :  { %p428_p0 = scmp.ne.s32.totalorder %s720_s0, %s427_s21  ;;  %p431_p1 = scmp.lt.u32.totalorder %s427_s21, %s720_s0 }
   0x7   :  { %p433_p2 = pnand %p431_p1, %p428_p0 }
   0x9   :  { %436 = shalt.err (!%p433_p2)
}
   0xa   :  { %s437_s26 = scalar_lea.vmem %s19_s16, 256  ;;  %p442_p4 = scmp.lt.s32.totalorder %s19_s16, %s19_s16 }
   0xb   :  { %p438_p3 = scmp.ne.s32.totalorder %s19_s16, %s437_s26  ;;  %p443_p5 = scmp.lt.s32.totalorder %s437_s26, %s437_s26 }
   0xd   :  { %p444_p6 = por %p443_p5, %p442_p4 }
   0xf   :  { %p445_p7 = pnand %p444_p6, %p438_p3 }
  0x11   :  { %448 = shalt.err (!%p445_p7)
}
  0x12   :  { %21 = dma.hbm_to_vmem [thread:$0]  %s720_s0, 256, %s19_s16, [#allocation3]  }
  0x13   :  { %s449_s5 = scalar_lea.hbm %s721_s1, 256 }
  0x14   :  { %p450_p8 = scmp.ne.s32.totalorder %s721_s1, %s449_s5  ;;  %p453_p9 = scmp.lt.u32.totalorder %s449_s5, %s721_s1 }
  0x16   :  { %p455_p10 = pnand %p453_p9, %p450_p8 }
  0x18   :  { %458 = shalt.err (!%p455_p10)
}
  0x19   :  { %s459_s10 = scalar_lea.vmem %s29_s18, 256  ;;  %p464_p12 = scmp.lt.s32.totalorder %s29_s18, %s29_s18 }
  0x1a   :  { %p460_p11 = scmp.ne.s32.totalorder %s29_s18, %s459_s10  ;;  %p465_p13 = scmp.lt.s32.totalorder %s459_s10, %s459_s10 }
  0x1c   :  { %p466_p0 = por %p465_p13, %p464_p12 }
  0x1e   :  { %p467_p1 = pnand %p466_p0, %p460_p11 }
  0x20   :  { %470 = shalt.err (!%p467_p1)
}
  0x21   :  { %31 = dma.hbm_to_vmem [thread:$0]  %s721_s1, 256, %s29_s18, [#allocation6]  }
  0x22   :  { %493 = dma.done.wait [#allocation3], 256  }
  0x23   :  { %494 = vsyncadd [#allocation3], 4294967040 }
  0x24   :  { %495 = dma.done.wait [#allocation6], 256  }
  0x25   :  { %496 = vsyncadd [#allocation6], 4294967040  ;;  %v501_v0 = vmov 2   ;;  %v502_v1 = vmov 1   ;;  %v44_v2 = vld [vmem:[%s722_s2] sm:$0xff]  ;;  %v572_v3 = vld [vmem:[#allocation2 + $0x8] sm:$0xff]  ;;  %v51_v22 = vlaneseq }
  0x26   :  { %416 = vset.pattern.permute.xlu1 %v501_v0  ;;  %415 = vset.pattern.permute.xlu0 %v502_v1  ;;  %v503_v4 = vmov 3   ;;  %s504_s14 = smov 17   ;;  %v505_v5 = vmov 5   ;;  %v575_v6 = vld [vmem:[#allocation2] sm:$0xff]  ;;  %s506_s1 = smov 16   ;;  %v507_v7 = vmov 4  }
  0x27   :  { %108 = vperm.xlu1 %416, %v44_v2   ;;  %83 = vperm.xlu0 %415, %v44_v2   ;;  %s508_s2 = smov 15   ;;  %v509_v8 = vmov 6   ;;  %v510_v9 = vmov 0   ;;  %s511_s15 = smov 1   ;;  %v512_v10 = vmov 7   ;;  %v516_v11 = vmov 8  }
  0x28   :  { %s513_s16 = smov 127   ;;  %s514_s17 = smov 113   ;;  %v258_v12 = vld [vmem:[%s723_s3] sm:$0xff]  ;;  %v599_v24 = vand.u32 127, %v51_v22  ;;  %v605_v27 = vshrl.u32 %v51_v22, 7  ;;  %v615_v32 = vld [vmem:[#allocation5] sm:$0xff] }
  0x29   :  { %s515_s18 = smov 112   ;;  %s517_s19 = smov 111   ;;  %v617_v33 = vld [vmem:[#allocation5 + $0x8] sm:$0xff] }
  0x2a   :  { %vm79_vm0 = vcmp.lt.s32.totalorder %v599_v24, 16  ;;  %vm53_vm1 = vcmp.lt.s32.totalorder %v599_v24, 17  ;;  %v610_v29 = vsub.s32 0, %v605_v27  ;;  %v613_v30 = vsub.s32 1, %v605_v27  ;;  %s518_s3 = smov [#allocation7]  }
  0x2b   :  { %417 = vset.pattern.permute.xlu1 %v503_v4  ;;  %49 = vrot.lane.b32.xlu0 %v572_v3, %s504_s14  ;;  %vm104_vm2 = vcmp.lt.s32.totalorder %v599_v24, 15  ;;  %v621_v38 = vsub.s32 2, %v605_v27  ;;  %vm129_vm3 = vcmp.lt.s32.totalorder %v599_v24, 1  ;;  %v639_v57 = vsub.s32 3, %v605_v27  ;;  %s381_s22 = sshll.u32 %s518_s3, 4  ;;  %s382_s22 = int_to_ptr.vmem [resolvable:$true] %s381_s22 }
  0x2c   :  { %133 = vperm.xlu1 %417, %v44_v2   ;;  %419 = vset.pattern.permute.xlu0 %v505_v5  ;;  %v66_v39 = vrot.slane %v615_v32, %v610_v29  ;;  %v70_v40 = vrot.slane %v617_v33, %v610_v29  ;;  %v91_v44 = vrot.slane %v615_v32, %v613_v30  ;;  %vm162_vm4 = vcmp.lt.s32.totalorder %v599_v24, 127  ;;  %s471_s23 = scalar_lea.vmem %s382_s22, 512  ;;  %p476_p3 = scmp.lt.s32.totalorder %s382_s22, %s382_s22 }
  0x2d   :  { %v95_v45 = vrot.slane %v617_v33, %v613_v30  ;;  %v116_v50 = vrot.slane %v615_v32, %v621_v38  ;;  %v120_v56 = vrot.slane %v617_v33, %v621_v38  ;;  %vm187_vm5 = vcmp.lt.s32.totalorder %v599_v24, 113  ;;  %p472_p2 = scmp.ne.s32.totalorder %s382_s22, %s471_s23  ;;  %p477_p4 = scmp.lt.s32.totalorder %s471_s23, %s471_s23 }
  0x2e   :  { %v656_v22 = vsub.s32 6, %v605_v27  ;;  %vm212_vm6 = vcmp.lt.s32.totalorder %v599_v24, 112  ;;  %vm237_vm7 = vcmp.lt.s32.totalorder %v599_v24, 111 }
  0x2f   :  { %77 = vrot.lane.b32.xlu0 %v572_v3, %s506_s1  ;;  %p478_p5 = por %p477_p4, %p476_p3 }
  0x30   :  { %47 = vrot.lane.b32.xlu1 %v575_v6, %s504_s14 }
  0x31   :  { %418 = vset.pattern.permute.xlu1 %v507_v7  ;;  %p479_p6 = pnand %p478_p5, %p472_p2 }
  0x33   :  { %102 = vrot.lane.b32.xlu0 %v572_v3, %s508_s2 }
  0x34   :  { %75 = vrot.lane.b32.xlu1 %v575_v6, %s506_s1 }
  0x37   :  { %166 = vperm.xlu0 %419, %v44_v2  }
  0x38   :  { %100 = vrot.lane.b32.xlu1 %v575_v6, %s508_s2 }
  0x3b   :  { %420 = vset.pattern.permute.xlu0 %v509_v8 }
  0x3c   :  { %191 = vperm.xlu0 %420, %v44_v2   ;;  %151 = vperm.xlu1 %418, %v44_v2  }
  0x40   :  { %421 = vset.pattern.permute.xlu0 %v510_v9  ;;  %125 = vrot.lane.b32.xlu1 %v575_v6, %s511_s15 }
  0x41   :  { %58 = vperm.xlu0 %421, %v44_v2   ;;  %422 = vset.pattern.permute.xlu1 %v512_v10  ;;  %v647_v10 = vsub.s32 4, %v605_v27 }
  0x44   :  { %127 = vrot.lane.b32.xlu1 %v572_v3, %s511_s15 }
  0x45   :  { %160 = vrot.lane.b32.xlu0 %v572_v3, %s513_s16 }
  0x48   :  { %216 = vperm.xlu1 %422, %v44_v2  }
  0x49   :  { %183 = vrot.lane.b32.xlu0 %v575_v6, %s514_s17 }
  0x4c   :  { %158 = vrot.lane.b32.xlu1 %v575_v6, %s513_s16 }
  0x4d   :  { %208 = vrot.lane.b32.xlu0 %v575_v6, %s515_s18  ;;  %423 = vset.pattern.permute.xlu1 %v516_v11 }
  0x50   :  { %241 = vperm.xlu1 %423, %v44_v2   ;;  %v141_v2 = vrot.slane %v615_v32, %v639_v57 }
  0x51   :  { %233 = vrot.lane.b32.xlu0 %v575_v6, %s517_s19 }
  0x54   :  { %185 = vrot.lane.b32.xlu1 %v572_v3, %s514_s17 }
  0x55   :  { %269 = vperm.xlu0 %421, %v258_v12   ;;  %424 = vset.pattern.permute.xlu1 %v502_v1 }
  0x58   :  { %210 = vrot.lane.b32.xlu1 %v572_v3, %s515_s18 }
  0x59   :  { %426 = vset.pattern.permute.xlu0 %v503_v4  ;;  %v145_v4 = vrot.slane %v617_v33, %v639_v57 }
  0x5a   :  { %317 = vperm.xlu0 %426, %v258_v12  }
  0x5c   :  { %235 = vrot.lane.b32.xlu1 %v572_v3, %s517_s19 }
  0x60   :  { %285 = vperm.xlu1 %424, %v258_v12  }
  0x64   :  { %425 = vset.pattern.permute.xlu1 %v501_v0 }
  0x65   :  { %301 = vperm.xlu1 %425, %v258_v12  }
  0xa6   :  { %v109_v13 = vpop.permute.xlu1 %108  ;;  %v84_v14 = vpop.permute.xlu0 %83 }
  0xaa   :  { %v50_v15 = vpop.permute.xlu0 %49 }
  0xab   :  { %v134_v16 = vpop.permute.xlu1 %133 }
  0xae   :  { %v78_v17 = vpop.permute.xlu0 %77 }
  0xaf   :  { %v48_v18 = vpop.permute.xlu1 %47 }
  0xb0   :  { %v54_v36 = vsel %vm53_vm1, %v48_v18, %v50_v15  ;;  %v55_v37 = vsel %vm53_vm1, %v50_v15, %v48_v18  ;;  %v650_v15 = vsub.s32 5, %v605_v27 }
  0xb2   :  { %v103_v19 = vpop.permute.xlu0 %102 }
  0xb3   :  { %v76_v20 = vpop.permute.xlu1 %75 }
  0xb4   :  { %v80_v34 = vsel %vm79_vm0, %v76_v20, %v78_v17  ;;  %v81_v35 = vsel %vm79_vm0, %v78_v17, %v76_v20 }
  0xb5   :  { %v86_v46 = vmul.f32 %v84_v14, %v81_v35  ;;  %v87_v47 = vmul.f32 %v84_v14, %v80_v34  ;;  %v199_v34 = vrot.slane %v615_v32, %v650_v15 }
  0xb6   :  { %v597_v21 = vpop.permute.xlu0 %166 }
  0xb7   :  { %v101_v23 = vpop.permute.xlu1 %100  ;;  %v96_v54 = vmul.f32 %v91_v44, %v86_v46  ;;  %v97_v55 = vmul.f32 %v95_v45, %v87_v47  ;;  %v224_v46 = vrot.slane %v615_v32, %v656_v22  ;;  %v676_v47 = vsub.s32 7, %v605_v27 }
  0xb8   :  { %v105_v48 = vsel %vm104_vm2, %v101_v23, %v103_v19  ;;  %v106_v49 = vsel %vm104_vm2, %v103_v19, %v101_v23  ;;  %v178_v23 = vrot.slane %v617_v33, %v647_v10 }
  0xb9   :  { %v111_v58 = vmul.f32 %v109_v13, %v106_v49  ;;  %v112_v59 = vmul.f32 %v109_v13, %v105_v48  ;;  %v249_v27 = vrot.slane %v615_v32, %v676_v47 }
  0xbb   :  { %v601_v25 = vpop.permute.xlu1 %151  ;;  %v603_v26 = vpop.permute.xlu0 %191  ;;  %v121_v8 = vmul.f32 %v116_v50, %v111_v58  ;;  %v122_v9 = vmul.f32 %v120_v56, %v112_v59  ;;  %v228_v50 = vrot.slane %v617_v33, %v656_v22  ;;  %v253_v58 = vrot.slane %v617_v33, %v676_v47 }
  0xbc   :  { %v155_v45 = vmul.f32 %v601_v25, %v572_v3 }
  0xbf   :  { %v126_v28 = vpop.permute.xlu1 %125 }
  0xc0   :  { %v59_v31 = vpop.permute.xlu0 %58 }
  0xc1   :  { %v61_v41 = vmul.f32 %v59_v31, %v55_v37  ;;  %v62_v42 = vmul.f32 %v59_v31, %v54_v36 }
  0xc3   :  { %v128_v43 = vpop.permute.xlu1 %127  ;;  %v71_v51 = vmul.f32 %v66_v39, %v61_v41  ;;  %v72_v52 = vmul.f32 %v70_v40, %v62_v42  ;;  %v203_v42 = vrot.slane %v617_v33, %v650_v15 }
  0xc4   :  { %v130_v60 = vsel %vm129_vm3, %v126_v28, %v128_v43  ;;  %v131_v61 = vsel %vm129_vm3, %v128_v43, %v126_v28  ;;  %v161_v62 = vpop.permute.xlu0 %160 }
  0xc5   :  { %v98_v63 = vadd.f32 %v96_v54, %v71_v51  ;;  %v99_v0 = vadd.f32 %v97_v55, %v72_v52  ;;  %v136_v5 = vmul.f32 %v134_v16, %v131_v61  ;;  %v137_v7 = vmul.f32 %v134_v16, %v130_v60 }
  0xc6   :  { %v174_v16 = vrot.slane %v615_v32, %v647_v10 }
  0xc7   :  { %v634_v53 = vpop.permute.xlu1 %216  ;;  %v123_v11 = vadd.f32 %v121_v8, %v98_v63  ;;  %v124_v12 = vadd.f32 %v122_v9, %v99_v0  ;;  %v146_v17 = vmul.f32 %v141_v2, %v136_v5  ;;  %v147_v18 = vmul.f32 %v145_v4, %v137_v7 }
  0xc8   :  { %v184_v13 = vpop.permute.xlu0 %183 }
  0xc9   :  { %v148_v36 = vadd.f32 %v146_v17, %v123_v11  ;;  %v149_v37 = vadd.f32 %v147_v18, %v124_v12 }
  0xcb   :  { %v159_v1 = vpop.permute.xlu1 %158  ;;  %v157_v52 = vadd.f32 %v155_v45, %v149_v37 }
  0xcc   :  { %v163_v19 = vsel %vm162_vm4, %v159_v1, %v161_v62  ;;  %v164_v20 = vsel %vm162_vm4, %v161_v62, %v159_v1  ;;  %v209_v41 = vpop.permute.xlu0 %208 }
  0xcd   :  { %v169_v28 = vmul.f32 %v597_v21, %v163_v19  ;;  %v170_v31 = vmul.f32 %v597_v21, %v164_v20  ;;  %v154_v21 = vmul.f32 %v601_v25, %v575_v6 }
  0xcf   :  { %v242_v14 = vpop.permute.xlu1 %241  ;;  %v179_v48 = vmul.f32 %v174_v16, %v169_v28  ;;  %v180_v49 = vmul.f32 %v178_v23, %v170_v31  ;;  %v156_v51 = vadd.f32 %v154_v21, %v148_v36 }
  0xd0   :  { %v234_v61 = vpop.permute.xlu0 %233 }
  0xd1   :  { %v181_v59 = vadd.f32 %v179_v48, %v156_v51  ;;  %v182_v60 = vadd.f32 %v180_v49, %v157_v52 }
  0xd3   :  { %v186_v35 = vpop.permute.xlu1 %185 }
  0xd4   :  { %v188_v39 = vsel %vm187_vm5, %v184_v13, %v186_v35  ;;  %v189_v40 = vsel %vm187_vm5, %v186_v35, %v184_v13  ;;  %v270_v20 = vpop.permute.xlu0 %269 }
  0xd5   :  { %v194_v43 = vmul.f32 %v603_v26, %v188_v39  ;;  %v195_v44 = vmul.f32 %v603_v26, %v189_v40 }
  0xd7   :  { %v211_v26 = vpop.permute.xlu1 %210  ;;  %v204_v55 = vmul.f32 %v199_v34, %v194_v43  ;;  %v205_v3 = vmul.f32 %v203_v42, %v195_v44 }
  0xd8   :  { %v213_v6 = vsel %vm212_vm6, %v209_v41, %v211_v26  ;;  %v214_v54 = vsel %vm212_vm6, %v211_v26, %v209_v41 }
  0xd9   :  { %v219_v25 = vmul.f32 %v634_v53, %v213_v6  ;;  %v220_v56 = vmul.f32 %v634_v53, %v214_v54  ;;  %v206_v4 = vadd.f32 %v204_v55, %v181_v59  ;;  %v207_v53 = vadd.f32 %v205_v3, %v182_v60 }
  0xdb   :  { %v229_v62 = vmul.f32 %v224_v46, %v219_v25  ;;  %v230_v63 = vmul.f32 %v228_v50, %v220_v56  ;;  %v236_v0 = vpop.permute.xlu1 %235 }
  0xdc   :  { %v238_v1 = vsel %vm237_vm7, %v234_v61, %v236_v0  ;;  %v239_v2 = vsel %vm237_vm7, %v236_v0, %v234_v61 }
  0xdd   :  { %v244_v5 = vmul.f32 %v242_v14, %v238_v1  ;;  %v245_v7 = vmul.f32 %v242_v14, %v239_v2  ;;  %v231_v32 = vadd.f32 %v229_v62, %v206_v4  ;;  %v232_v8 = vadd.f32 %v230_v63, %v207_v53 }
  0xdf   :  { %v254_v9 = vmul.f32 %v249_v27, %v244_v5  ;;  %v255_v33 = vmul.f32 %v253_v58, %v245_v7  ;;  %v286_v13 = vpop.permute.xlu1 %285 }
  0xe1   :  { %v256_v11 = vadd.f32 %v254_v9, %v231_v32  ;;  %v257_v12 = vadd.f32 %v255_v33, %v232_v8 }
  0xe3   :  { %v279_v17 = vrot.slane %v256_v11, %v613_v30  ;;  %v283_v18 = vrot.slane %v257_v12, %v613_v30  ;;  %v341_v19 = vrot.slane %v256_v11, %v650_v15  ;;  %v345_v24 = vrot.slane %v257_v12, %v650_v15 }
  0xe4   :  { %v262_v31 = vrot.slane %v256_v11, %v610_v29  ;;  %v266_v34 = vrot.slane %v257_v12, %v610_v29  ;;  %v295_v35 = vrot.slane %v256_v11, %v621_v38  ;;  %v299_v36 = vrot.slane %v257_v12, %v621_v38  ;;  %v302_v40 = vpop.permute.xlu1 %301  ;;  %v318_v29 = vpop.permute.xlu0 %317 }
  0xe5   :  { %v288_v16 = vmul.f32 %v286_v13, %v279_v17  ;;  %v289_v23 = vmul.f32 %v286_v13, %v283_v18  ;;  %v346_v28 = vmul.f32 %v341_v19, %v286_v13  ;;  %v347_v14 = vmul.f32 %v345_v24, %v286_v13 }
  0xe6   :  { %v329_v37 = vrot.slane %v256_v11, %v647_v10  ;;  %v333_v30 = vrot.slane %v257_v12, %v647_v10  ;;  %v353_v39 = vrot.slane %v256_v11, %v656_v22  ;;  %v357_v15 = vrot.slane %v257_v12, %v656_v22 }
  0xe7   :  { %v311_v41 = vrot.slane %v256_v11, %v639_v57  ;;  %v315_v42 = vrot.slane %v257_v12, %v639_v57  ;;  %v272_v43 = vmul.f32 %v270_v20, %v262_v31  ;;  %v273_v44 = vmul.f32 %v270_v20, %v266_v34 }
  0xe8   :  { %v365_v21 = vrot.slane %v256_v11, %v676_v47  ;;  %v369_v38 = vrot.slane %v257_v12, %v676_v47  ;;  %v334_v45 = vmul.f32 %v329_v37, %v270_v20  ;;  %v335_v46 = vmul.f32 %v333_v30, %v270_v20 }
  0xe9   :  { %v290_v48 = vadd.f32 %v288_v16, %v272_v43  ;;  %v291_v10 = vadd.f32 %v289_v23, %v273_v44  ;;  %v304_v49 = vmul.f32 %v302_v40, %v295_v35  ;;  %v305_v50 = vmul.f32 %v302_v40, %v299_v36 }
  0xea   :  { %v348_v26 = vadd.f32 %v346_v28, %v334_v45  ;;  %v349_v22 = vadd.f32 %v347_v14, %v335_v46  ;;  %v358_v51 = vmul.f32 %v353_v39, %v302_v40  ;;  %v359_v52 = vmul.f32 %v357_v15, %v302_v40 }
  0xeb   :  { %v320_v6 = vmul.f32 %v318_v29, %v311_v41  ;;  %v321_v54 = vmul.f32 %v318_v29, %v315_v42  ;;  %v306_v57 = vadd.f32 %v304_v49, %v290_v48  ;;  %v307_v55 = vadd.f32 %v305_v50, %v291_v10 }
  0xec   :  { %v370_v3 = vmul.f32 %v365_v21, %v318_v29  ;;  %v371_v25 = vmul.f32 %v369_v38, %v318_v29  ;;  %v360_v56 = vadd.f32 %v358_v51, %v348_v26  ;;  %v361_v47 = vadd.f32 %v359_v52, %v349_v22 }
  0xed   :  { %v322_v27 = vadd.f32 %v320_v6, %v306_v57  ;;  %v323_v58 = vadd.f32 %v321_v54, %v307_v55 }
  0xee   :  { %v372_v59 = vadd.f32 %v370_v3, %v360_v56  ;;  %v373_v60 = vadd.f32 %v371_v25, %v361_v47 }
  0xef   :  { %324 = vst [vmem:[#allocation7] sm:$0xff] %v322_v27  ;;  %325 = vst [vmem:[#allocation7 + $0x8] sm:$0xff] %v323_v58 }
  0xf0   :  { %374 = vst [vmem:[#allocation7 + $0x10] sm:$0xff] %v372_v59  ;;  %375 = vst [vmem:[#allocation7 + $0x18] sm:$0xff] %v373_v60 }
  0xf1   :  { %482 = shalt.err (!%p479_p6)
}
  0xf2   :  { %s483_s26 = scalar_lea.hbm %s724_s4, 512 }
  0xf3   :  { %p484_p7 = scmp.ne.s32.totalorder %s724_s4, %s483_s26  ;;  %p487_p8 = scmp.lt.u32.totalorder %s483_s26, %s724_s4 }
  0xf5   :  { %p489_p9 = pnand %p487_p8, %p484_p7 }
  0xf7   :  { %492 = shalt.err (!%p489_p9)
}
  0xf8   :  { %s519_s5 = smov 256  }
  0xf9   :  { %387 = dma.vmem_to_hbm [thread:$0]  %s382_s22, 512, %s724_s4, [#allocation4], %s519_s5, %s519_s5, %s506_s1  }
  0xfa   :  { %497 = dma.done.wait [#allocation4], 512  }
  0xfb   :  { %498 = vsyncadd [#allocation4], 4294966784 }
  0xfc   :  { %391 = vsyncpa [#allocation3], 1 }
  0xfd   :  { %392 = vsyncpa [#allocation6], 1 }
  0xfe   :  { %393 = vsyncpa [#allocation4], 1 }

</bundles_post_ra>
